<compile_context>
chip_gen: v6e
topology: v6e:2x2x1
jax: 0.10.0
libtpu: 0.0.40
codegen_flags: <defaults>
</compile_context>

<pallas_src>
import math
import functools

import jax
import jax.numpy as jnp
from jax import lax
from jax.experimental import pallas as pl
from jax.experimental.pallas import tpu as pltpu


# ------------------------------- helpers ------------------------------------

def _pick_tile(dim, preferred, min_tile=8):
    """Largest tile <= preferred that evenly divides dim (falls back to full dim)."""
    if dim <= preferred:
        return dim
    t = preferred
    while t > min_tile and dim % t != 0:
        t //= 2
    return t if dim % t == 0 else dim


def _vmem_limit(*byte_terms):
    """Scoped-VMEM request sized to the chosen tiles, clamped to [32 MiB, 64 MiB]."""
    need = sum(byte_terms)
    return int(min(max(2 * need + (4 << 20), 32 << 20), 64 << 20))


# --------------------------- tiled linear kernel -----------------------------

def _linear_kernel(x_ref, w_ref, b_ref, o_ref, acc_ref):
    # grid = (M/tm, N/tn, K/tk); K is the reduction axis (last, "arbitrary").
    k = pl.program_id(2)

    @pl.when(k == 0)
    def _():
        acc_ref[...] = jnp.zeros_like(acc_ref)

    acc_ref[...] += jnp.dot(x_ref[...], w_ref[...],
                            preferred_element_type=jnp.float32)

    @pl.when(k == pl.num_programs(2) - 1)
    def _():
        o_ref[...] = (acc_ref[...] + b_ref[...]).astype(o_ref.dtype)


def linear_pallas(x, w, b, *, tm=256, tn=256, tk=512):
    """y = x @ w + b with x: (M, K), w: (K, N) (already transposed), b: (N,)."""
    M, K = x.shape
    N = w.shape[1]
    tm = _pick_tile(M, tm)
    tn = _pick_tile(N, tn)
    tk = _pick_tile(K, tk)
    grid = (M // tm, N // tn, K // tk)
    isz = x.dtype.itemsize

    vmem = _vmem_limit(
        2 * (tm * tk + tk * tn + tn) * isz,   # double-buffered input tiles
        2 * tm * tn * isz,                    # double-buffered output tile
        tm * tn * 4,                          # f32 accumulator scratch
    )
    cost = pl.CostEstimate(
        flops=2 * M * N * K,
        transcendentals=0,
        bytes_accessed=(M * K + K * N + M * N + N) * isz,
    )

    return pl.pallas_call(
        _linear_kernel,
        out_shape=jax.ShapeDtypeStruct((M, N), x.dtype),
        grid=grid,
        in_specs=[
            pl.BlockSpec((tm, tk), lambda i, j, k: (i, k)),
            pl.BlockSpec((tk, tn), lambda i, j, k: (k, j)),
            pl.BlockSpec((1, tn), lambda i, j, k: (0, j)),
        ],
        out_specs=pl.BlockSpec((tm, tn), lambda i, j, k: (i, j)),
        scratch_shapes=[pltpu.VMEM((tm, tn), jnp.float32)],
        compiler_params=pltpu.CompilerParams(
            dimension_semantics=("parallel", "parallel", "arbitrary"),
            vmem_limit_bytes=vmem),
        cost_estimate=cost,
    )(x, w, b.reshape(1, N))


# ----------------------- flash-style attention kernel ------------------------

def _flash_attention_kernel(q_ref, k_ref, v_ref, o_ref,
                            m_ref, l_ref, acc_ref, *, scale):
    # grid = (B*H, T/tq, T/tkv); blocks are (1, tq, hd) / (1, tkv, hd).
    kv = pl.program_id(2)

    @pl.when(kv == 0)
    def _():
        m_ref[...] = jnp.full(m_ref.shape, -jnp.inf, m_ref.dtype)
        l_ref[...] = jnp.zeros(l_ref.shape, l_ref.dtype)
        acc_ref[...] = jnp.zeros(acc_ref.shape, acc_ref.dtype)

    q = q_ref[0] * scale            # (tq, hd) — scale folded into q (cheaper than s)
    k = k_ref[0]                    # (tkv, hd)
    v = v_ref[0]                    # (tkv, hd)

    # Contract the head dims directly — no k.T / relayout materialized.
    s = lax.dot_general(q, k, (((1,), (1,)), ((), ())),
                        preferred_element_type=jnp.float32)          # (tq, tkv)

    m_prev = m_ref[...]
    m_new = jnp.maximum(m_prev, jnp.max(s, axis=-1, keepdims=True))
    alpha = jnp.exp(m_prev - m_new)
    p = jnp.exp(s - m_new)
    l_ref[...] = alpha * l_ref[...] + jnp.sum(p, axis=-1, keepdims=True)
    acc_ref[...] = alpha * acc_ref[...] + lax.dot_general(
        p.astype(v.dtype), v, (((1,), (0,)), ((), ())),
        preferred_element_type=jnp.float32)
    m_ref[...] = m_new

    @pl.when(kv == pl.num_programs(2) - 1)
    def _():
        inv_l = pl.reciprocal(l_ref[...], approx=True)   # EUP slot, ~free
        o_ref[0] = (acc_ref[...] * inv_l).astype(o_ref.dtype)


def attention_pallas(q, k, v, *, tq=256, tkv=256):
    """Non-causal scaled dot-product attention. q, k, v: (B*H, T, hd)."""
    BH, T, hd = q.shape
    tq = _pick_tile(T, tq)
    tkv = _pick_tile(T, tkv)
    scale = 1.0 / math.sqrt(hd)
    grid = (BH, T // tq, T // tkv)
    isz = q.dtype.itemsize

    vmem = _vmem_limit(
        2 * (tq * hd + 2 * tkv * hd) * isz,          # double-buffered q/k/v tiles
        2 * tq * hd * isz,                           # double-buffered output tile
        tq * tkv * 4 + tq * hd * 4 + 2 * tq * 4,     # scores + acc + m/l scratch (f32)
    )
    cost = pl.CostEstimate(
        flops=4 * BH * T * T * hd,
        transcendentals=BH * T * T,
        bytes_accessed=4 * BH * T * hd * isz,
    )

    kernel = functools.partial(_flash_attention_kernel, scale=scale)
    return pl.pallas_call(
        kernel,
        out_shape=jax.ShapeDtypeStruct((BH, T, hd), q.dtype),
        grid=grid,
        in_specs=[
            pl.BlockSpec((1, tq, hd), lambda b, qi, kv: (b, qi, 0)),
            pl.BlockSpec((1, tkv, hd), lambda b, qi, kv: (b, kv, 0)),
            pl.BlockSpec((1, tkv, hd), lambda b, qi, kv: (b, kv, 0)),
        ],
        out_specs=pl.BlockSpec((1, tq, hd), lambda b, qi, kv: (b, qi, 0)),
        scratch_shapes=[
            pltpu.VMEM((tq, 1), jnp.float32),    # running max m
            pltpu.VMEM((tq, 1), jnp.float32),    # running denom l
            pltpu.VMEM((tq, hd), jnp.float32),   # running accumulator
        ],
        compiler_params=pltpu.CompilerParams(
            dimension_semantics=("parallel", "parallel", "arbitrary"),
            vmem_limit_bytes=vmem),
        cost_estimate=cost,
    )(q, k, v)


# --------------------------------- forward -----------------------------------

@functools.partial(jax.jit, static_argnames=("n_head",))
def full_self_attention(x, w_attn, b_attn, w_proj, b_proj, n_head):
    """Forward pass of FullSelfAttention (eval mode, dropout = 0)."""
    B, T, C = x.shape
    hd = C // n_head

    # c_attn: (B*T, C) @ (C, 3C) + b
    qkv = linear_pallas(x.reshape(B * T, C), w_attn, b_attn)        # (B*T, 3C)

    # Head split: one free reshape + a single fused transpose of the whole qkv tensor
    # (instead of 3x split + 3x transpose in the old version).
    # TODO(synk): for realistic head_dim (>=128) fold this slicing directly into the
    # attention BlockSpec index_map to remove the remaining full-tensor HBM pass.
    qkv = qkv.reshape(B, T, 3, n_head, hd).transpose(2, 0, 3, 1, 4)  # (3, B, H, T, hd)
    q = qkv[0].reshape(B * n_head, T, hd)
    k = qkv[1].reshape(B * n_head, T, hd)
    v = qkv[2].reshape(B * n_head, T, hd)

    # non-causal flash attention
    y = attention_pallas(q, k, v)                                   # (B*H, T, hd)

    # merge heads and c_proj
    y = y.reshape(B, n_head, T, hd).transpose(0, 2, 1, 3).reshape(B * T, C)
    y = linear_pallas(y, w_proj, b_proj)                            # (B*T, C)
    # Dropout layers (attn_dropout / resid_dropout) are identity in eval mode (p=0.0).
    return y.reshape(B, T, C)


# ----------------------------------- main -------------------------------------

if __name__ == "__main__":
    # Small config consistent with the module: n_embd=32, n_head=4, bias=True.
    B, T, C, n_head = 2, 8, 32, 4

    key = jax.random.PRNGKey(0)
    kx, kw1, kb1, kw2, kb2 = jax.random.split(key, 5)

    x = jax.random.normal(kx, (B, T, C), dtype=jnp.float32)

    # PyTorch nn.Linear-style init: U(-1/sqrt(fan_in), 1/sqrt(fan_in)).
    # Weights stored already transposed: (Cin, Cout) so kernels compute x @ w.
    bound = 1.0 / math.sqrt(C)
    w_attn = jax.random.uniform(kw1, (C, 3 * C), jnp.float32, -bound, bound)
    b_attn = jax.random.uniform(kb1, (3 * C,), jnp.float32, -bound, bound)
    w_proj = jax.random.uniform(kw2, (C, C), jnp.float32, -bound, bound)
    b_proj = jax.random.uniform(kb2, (C,), jnp.float32, -bound, bound)

    out = full_self_attention(x, w_attn, b_attn, w_proj, b_proj, n_head)
    out = jax.block_until_ready(out)

    # Cross-check against a pure-JAX reference of the same math.
    def ref(x):
        qkv = x.reshape(B * T, C) @ w_attn + b_attn
        q, k, v = jnp.split(qkv, 3, axis=-1)
        sh = lambda t: t.reshape(B, T, n_head, C // n_head).transpose(0, 2, 1, 3)
        q, k, v = sh(q), sh(k), sh(v)
        s = jnp.einsum("bhqd,bhkd->bhqk", q, k) / math.sqrt(C // n_head)
        p = jax.nn.softmax(s, axis=-1)
        y = jnp.einsum("bhqk,bhkd->bhqd", p, v)
        y = y.transpose(0, 2, 1, 3).reshape(B * T, C)
        return (y @ w_proj + b_proj).reshape(B, T, C)

    # Tolerance accounts for the EUP approximate reciprocal used for the softmax
    # normalization (exact-path agreement is <1e-5).
    assert jnp.allclose(out, ref(x), atol=1e-3, rtol=1e-3), "mismatch vs reference"
    print("KERNEL_OK")
</pallas_src>

<mosaic_0001>
module attributes {stable_mosaic.version = 11 : i64} {
  func.func @_linear_kernel(%arg0: i32, %arg1: i32, %arg2: i32, %arg3: memref<16x32xf32, #tpu.memory_space<vmem>>, %arg4: memref<32x96xf32, #tpu.memory_space<vmem>>, %arg5: memref<1x96xf32, #tpu.memory_space<vmem>>, %arg6: memref<16x96xf32, #tpu.memory_space<vmem>>, %arg7: memref<16x96xf32, #tpu.memory_space<vmem>>) attributes {dimension_semantics = [#tpu.dimension_semantics<parallel>, #tpu.dimension_semantics<parallel>, #tpu.dimension_semantics<arbitrary>], iteration_bounds = array<i64: 1, 1, 1>, scalar_prefetch = 0 : i64, scratch_operands = 1 : i64, tpu.core_type = #tpu.core_type<tc>, window_params = [{transform_indices = @transform_0, window_bounds = array<i64: 16, 32>}, {transform_indices = @transform_1, window_bounds = array<i64: 32, 96>}, {transform_indices = @transform_2, window_bounds = array<i64: 1, 96>}, {transform_indices = @transform_3, window_bounds = array<i64: 16, 96>}]} {
    %c0_i32 = arith.constant 0 : i32
    %0 = arith.cmpi eq, %arg2, %c0_i32 : i32
    %1 = arith.extui %0 : i1 to i32
    %c0_i32_0 = arith.constant 0 : i32
    %2 = arith.cmpi ne, %1, %c0_i32_0 : i32
    scf.if %2 {
      %cst_10 = arith.constant 0.000000e+00 : f32
      %12 = vector.broadcast %cst_10 : f32 to vector<16x96xf32>
      %c0_11 = arith.constant 0 : index
      %c0_12 = arith.constant 0 : index
      %13 = vector.load %arg7[%c0_11, %c0_12] : memref<16x96xf32, #tpu.memory_space<vmem>>, vector<16x96xf32>
      tpu.vector_store %arg7[%c0_11, %c0_12], %12 {strides = array<i32>} : memref<16x96xf32, #tpu.memory_space<vmem>>, vector<16x96xf32>,
    } else {
    }
    %c0 = arith.constant 0 : index
    %c0_1 = arith.constant 0 : index
    %3 = vector.load %arg7[%c0, %c0_1] : memref<16x96xf32, #tpu.memory_space<vmem>>, vector<16x96xf32>
    %c0_2 = arith.constant 0 : index
    %c0_3 = arith.constant 0 : index
    %4 = vector.load %arg3[%c0_2, %c0_3] : memref<16x32xf32, #tpu.memory_space<vmem>>, vector<16x32xf32>
    %c0_4 = arith.constant 0 : index
    %c0_5 = arith.constant 0 : index
    %5 = vector.load %arg4[%c0_4, %c0_5] : memref<32x96xf32, #tpu.memory_space<vmem>>, vector<32x96xf32>
    %cst = arith.constant dense<0.000000e+00> : vector<16x96xf32>
    %6 = tpu.matmul %4, %5, %cst {dimension_numbers = #tpu.dot_dimension_numbers<[1], [0], [0], [1], [0, 0, 1, 1], [], []>} : vector<16x32xf32>, vector<32x96xf32>, vector<16x96xf32> -> vector<16x96xf32>
    %7 = arith.addf %3, %6 : vector<16x96xf32>
    %c0_6 = arith.constant 0 : index
    %c0_7 = arith.constant 0 : index
    %8 = vector.load %arg7[%c0_6, %c0_7] : memref<16x96xf32, #tpu.memory_space<vmem>>, vector<16x96xf32>
    tpu.vector_store %arg7[%c0_6, %c0_7], %7 {strides = array<i32>} : memref<16x96xf32, #tpu.memory_space<vmem>>, vector<16x96xf32>,
    %c0_i32_8 = arith.constant 0 : i32
    %9 = arith.cmpi eq, %arg2, %c0_i32_8 : i32
    %10 = arith.extui %9 : i1 to i32
    %c0_i32_9 = arith.constant 0 : i32
    %11 = arith.cmpi ne, %10, %c0_i32_9 : i32
    scf.if %11 {
      %c0_10 = arith.constant 0 : index
      %c0_11 = arith.constant 0 : index
      %12 = vector.load %arg7[%c0_10, %c0_11] : memref<16x96xf32, #tpu.memory_space<vmem>>, vector<16x96xf32>
      %c0_12 = arith.constant 0 : index
      %c0_13 = arith.constant 0 : index
      %13 = vector.load %arg5[%c0_12, %c0_13] : memref<1x96xf32, #tpu.memory_space<vmem>>, vector<1x96xf32>
      %14 = vector.broadcast %13 : vector<1x96xf32> to vector<16x96xf32>
      %15 = arith.addf %12, %14 : vector<16x96xf32>
      %c0_14 = arith.constant 0 : index
      %c0_15 = arith.constant 0 : index
      %16 = vector.load %arg6[%c0_14, %c0_15] : memref<16x96xf32, #tpu.memory_space<vmem>>, vector<16x96xf32>
      tpu.vector_store %arg6[%c0_14, %c0_15], %15 {strides = array<i32>} : memref<16x96xf32, #tpu.memory_space<vmem>>, vector<16x96xf32>,
    } else {
    }
    return
  }
  func.func @transform_0(%arg0: i32, %arg1: i32, %arg2: i32) -> (i32, i32) {
    %c0_i32 = arith.constant 0 : i32
    return %arg0, %arg2 : i32, i32
  }
  func.func @transform_1(%arg0: i32, %arg1: i32, %arg2: i32) -> (i32, i32) {
    %c0_i32 = arith.constant 0 : i32
    return %arg2, %arg1 : i32, i32
  }
  func.func @transform_2(%arg0: i32, %arg1: i32, %arg2: i32) -> (i32, i32) {
    %c0_i32 = arith.constant 0 : i32
    %c0_i32_0 = arith.constant 0 : i32
    return %c0_i32, %arg1 : i32, i32
  }
  func.func @transform_3(%arg0: i32, %arg1: i32, %arg2: i32) -> (i32, i32) {
    %c0_i32 = arith.constant 0 : i32
    return %arg0, %arg1 : i32, i32
  }
}

module attributes {stable_mosaic.version = 11 : i64} {
  func.func @_linear_kernel(%arg0: i32, %arg1: i32, %arg2: i32, %arg3: memref<16x32xf32, #tpu.memory_space<vmem>>, %arg4: memref<32x32xf32, #tpu.memory_space<vmem>>, %arg5: memref<1x32xf32, #tpu.memory_space<vmem>>, %arg6: memref<16x32xf32, #tpu.memory_space<vmem>>, %arg7: memref<16x32xf32, #tpu.memory_space<vmem>>) attributes {dimension_semantics = [#tpu.dimension_semantics<parallel>, #tpu.dimension_semantics<parallel>, #tpu.dimension_semantics<arbitrary>], iteration_bounds = array<i64: 1, 1, 1>, scalar_prefetch = 0 : i64, scratch_operands = 1 : i64, tpu.core_type = #tpu.core_type<tc>, window_params = [{transform_indices = @transform_0, window_bounds = array<i64: 16, 32>}, {transform_indices = @transform_1, window_bounds = array<i64: 32, 32>}, {transform_indices = @transform_2, window_bounds = array<i64: 1, 32>}, {transform_indices = @transform_3, window_bounds = array<i64: 16, 32>}]} {
    %c0_i32 = arith.constant 0 : i32
    %0 = arith.cmpi eq, %arg2, %c0_i32 : i32
    %1 = arith.extui %0 : i1 to i32
    %c0_i32_0 = arith.constant 0 : i32
    %2 = arith.cmpi ne, %1, %c0_i32_0 : i32
    scf.if %2 {
      %cst_10 = arith.constant 0.000000e+00 : f32
      %12 = vector.broadcast %cst_10 : f32 to vector<16x32xf32>
      %c0_11 = arith.constant 0 : index
      %c0_12 = arith.constant 0 : index
      %13 = vector.load %arg7[%c0_11, %c0_12] : memref<16x32xf32, #tpu.memory_space<vmem>>, vector<16x32xf32>
      tpu.vector_store %arg7[%c0_11, %c0_12], %12 {strides = array<i32>} : memref<16x32xf32, #tpu.memory_space<vmem>>, vector<16x32xf32>,
    } else {
    }
    %c0 = arith.constant 0 : index
    %c0_1 = arith.constant 0 : index
    %3 = vector.load %arg7[%c0, %c0_1] : memref<16x32xf32, #tpu.memory_space<vmem>>, vector<16x32xf32>
    %c0_2 = arith.constant 0 : index
    %c0_3 = arith.constant 0 : index
    %4 = vector.load %arg3[%c0_2, %c0_3] : memref<16x32xf32, #tpu.memory_space<vmem>>, vector<16x32xf32>
    %c0_4 = arith.constant 0 : index
    %c0_5 = arith.constant 0 : index
    %5 = vector.load %arg4[%c0_4, %c0_5] : memref<32x32xf32, #tpu.memory_space<vmem>>, vector<32x32xf32>
    %cst = arith.constant dense<0.000000e+00> : vector<16x32xf32>
    %6 = tpu.matmul %4, %5, %cst {dimension_numbers = #tpu.dot_dimension_numbers<[1], [0], [0], [1], [0, 0, 1, 1], [], []>} : vector<16x32xf32>, vector<32x32xf32>, vector<16x32xf32> -> vector<16x32xf32>
    %7 = arith.addf %3, %6 : vector<16x32xf32>
    %c0_6 = arith.constant 0 : index
    %c0_7 = arith.constant 0 : index
    %8 = vector.load %arg7[%c0_6, %c0_7] : memref<16x32xf32, #tpu.memory_space<vmem>>, vector<16x32xf32>
    tpu.vector_store %arg7[%c0_6, %c0_7], %7 {strides = array<i32>} : memref<16x32xf32, #tpu.memory_space<vmem>>, vector<16x32xf32>,
    %c0_i32_8 = arith.constant 0 : i32
    %9 = arith.cmpi eq, %arg2, %c0_i32_8 : i32
    %10 = arith.extui %9 : i1 to i32
    %c0_i32_9 = arith.constant 0 : i32
    %11 = arith.cmpi ne, %10, %c0_i32_9 : i32
    scf.if %11 {
      %c0_10 = arith.constant 0 : index
      %c0_11 = arith.constant 0 : index
      %12 = vector.load %arg7[%c0_10, %c0_11] : memref<16x32xf32, #tpu.memory_space<vmem>>, vector<16x32xf32>
      %c0_12 = arith.constant 0 : index
      %c0_13 = arith.constant 0 : index
      %13 = vector.load %arg5[%c0_12, %c0_13] : memref<1x32xf32, #tpu.memory_space<vmem>>, vector<1x32xf32>
      %14 = vector.broadcast %13 : vector<1x32xf32> to vector<16x32xf32>
      %15 = arith.addf %12, %14 : vector<16x32xf32>
      %c0_14 = arith.constant 0 : index
      %c0_15 = arith.constant 0 : index
      %16 = vector.load %arg6[%c0_14, %c0_15] : memref<16x32xf32, #tpu.memory_space<vmem>>, vector<16x32xf32>
      tpu.vector_store %arg6[%c0_14, %c0_15], %15 {strides = array<i32>} : memref<16x32xf32, #tpu.memory_space<vmem>>, vector<16x32xf32>,
    } else {
    }
    return
  }
  func.func @transform_0(%arg0: i32, %arg1: i32, %arg2: i32) -> (i32, i32) {
    %c0_i32 = arith.constant 0 : i32
    return %arg0, %arg2 : i32, i32
  }
  func.func @transform_1(%arg0: i32, %arg1: i32, %arg2: i32) -> (i32, i32) {
    %c0_i32 = arith.constant 0 : i32
    return %arg2, %arg1 : i32, i32
  }
  func.func @transform_2(%arg0: i32, %arg1: i32, %arg2: i32) -> (i32, i32) {
    %c0_i32 = arith.constant 0 : i32
    %c0_i32_0 = arith.constant 0 : i32
    return %c0_i32, %arg1 : i32, i32
  }
  func.func @transform_3(%arg0: i32, %arg1: i32, %arg2: i32) -> (i32, i32) {
    %c0_i32 = arith.constant 0 : i32
    return %arg0, %arg1 : i32, i32
  }
}

module attributes {stable_mosaic.version = 11 : i64} {
  func.func @_flash_attention_kernel(%arg0: i32, %arg1: i32, %arg2: i32, %arg3: memref<1x8x8xf32, #tpu.memory_space<vmem>>, %arg4: memref<1x8x8xf32, #tpu.memory_space<vmem>>, %arg5: memref<1x8x8xf32, #tpu.memory_space<vmem>>, %arg6: memref<1x8x8xf32, #tpu.memory_space<vmem>>, %arg7: memref<8x1xf32, #tpu.memory_space<vmem>>, %arg8: memref<8x1xf32, #tpu.memory_space<vmem>>, %arg9: memref<8x8xf32, #tpu.memory_space<vmem>>) attributes {dimension_semantics = [#tpu.dimension_semantics<parallel>, #tpu.dimension_semantics<parallel>, #tpu.dimension_semantics<arbitrary>], iteration_bounds = array<i64: 8, 1, 1>, scalar_prefetch = 0 : i64, scratch_operands = 3 : i64, tpu.core_type = #tpu.core_type<tc>, window_params = [{transform_indices = @transform_0, window_bounds = array<i64: 1, 8, 8>}, {transform_indices = @transform_1, window_bounds = array<i64: 1, 8, 8>}, {transform_indices = @transform_2, window_bounds = array<i64: 1, 8, 8>}, {transform_indices = @transform_3, window_bounds = array<i64: 1, 8, 8>}]} {
    %c0_i32 = arith.constant 0 : i32
    %0 = arith.cmpi eq, %arg2, %c0_i32 : i32
    %1 = arith.extui %0 : i1 to i32
    %c0_i32_0 = arith.constant 0 : i32
    %2 = arith.cmpi ne, %1, %c0_i32_0 : i32
    scf.if %2 {
      %cst_27 = arith.constant 0xFF800000 : f32
      %37 = vector.broadcast %cst_27 : f32 to vector<8x1xf32>
      %c0_28 = arith.constant 0 : index
      %c0_29 = arith.constant 0 : index
      %38 = vector.load %arg7[%c0_28, %c0_29] : memref<8x1xf32, #tpu.memory_space<vmem>>, vector<8x1xf32>
      tpu.vector_store %arg7[%c0_28, %c0_29], %37 {strides = array<i32>} : memref<8x1xf32, #tpu.memory_space<vmem>>, vector<8x1xf32>,
      %cst_30 = arith.constant 0.000000e+00 : f32
      %39 = vector.broadcast %cst_30 : f32 to vector<8x1xf32>
      %c0_31 = arith.constant 0 : index
      %c0_32 = arith.constant 0 : index
      %40 = vector.load %arg8[%c0_31, %c0_32] : memref<8x1xf32, #tpu.memory_space<vmem>>, vector<8x1xf32>
      tpu.vector_store %arg8[%c0_31, %c0_32], %39 {strides = array<i32>} : memref<8x1xf32, #tpu.memory_space<vmem>>, vector<8x1xf32>,
      %cst_33 = arith.constant 0.000000e+00 : f32
      %41 = vector.broadcast %cst_33 : f32 to vector<8x8xf32>
      %c0_34 = arith.constant 0 : index
      %c0_35 = arith.constant 0 : index
      %42 = vector.load %arg9[%c0_34, %c0_35] : memref<8x8xf32, #tpu.memory_space<vmem>>, vector<8x8xf32>
      tpu.vector_store %arg9[%c0_34, %c0_35], %41 {strides = array<i32>} : memref<8x8xf32, #tpu.memory_space<vmem>>, vector<8x8xf32>,
    } else {
    }
    %c0 = arith.constant 0 : index
    %c0_1 = arith.constant 0 : index
    %c0_2 = arith.constant 0 : index
    %3 = vector.load %arg3[%c0, %c0_1, %c0_2] : memref<1x8x8xf32, #tpu.memory_space<vmem>>, vector<1x8x8xf32>
    %4 = vector.shape_cast %3 : vector<1x8x8xf32> to vector<8x8xf32>
    %cst = arith.constant 0.353553385 : f32
    %5 = vector.broadcast %cst : f32 to vector<8x8xf32>
    %6 = arith.mulf %4, %5 : vector<8x8xf32>
    %c0_3 = arith.constant 0 : index
    %c0_4 = arith.constant 0 : index
    %c0_5 = arith.constant 0 : index
    %7 = vector.load %arg4[%c0_3, %c0_4, %c0_5] : memref<1x8x8xf32, #tpu.memory_space<vmem>>, vector<1x8x8xf32>
    %8 = vector.shape_cast %7 : vector<1x8x8xf32> to vector<8x8xf32>
    %c0_6 = arith.constant 0 : index
    %c0_7 = arith.constant 0 : index
    %c0_8 = arith.constant 0 : index
    %9 = vector.load %arg5[%c0_6, %c0_7, %c0_8] : memref<1x8x8xf32, #tpu.memory_space<vmem>>, vector<1x8x8xf32>
    %10 = vector.shape_cast %9 : vector<1x8x8xf32> to vector<8x8xf32>
    %cst_9 = arith.constant dense<0.000000e+00> : vector<8x8xf32>
    %11 = tpu.matmul %6, %8, %cst_9 {dimension_numbers = #tpu.dot_dimension_numbers<[1], [1], [0], [0], [0, 0, 1, 0], [], []>} : vector<8x8xf32>, vector<8x8xf32>, vector<8x8xf32> -> vector<8x8xf32>
    %c0_10 = arith.constant 0 : index
    %c0_11 = arith.constant 0 : index
    %12 = vector.load %arg7[%c0_10, %c0_11] : memref<8x1xf32, #tpu.memory_space<vmem>>, vector<8x1xf32>
    %cst_12 = arith.constant dense<0xFF800000> : vector<8xf32>
    %13 = vector.multi_reduction <maximumf>, %11, %cst_12 [1] : vector<8x8xf32> to vector<8xf32>
    %14 = vector.shape_cast %13 : vector<8xf32> to vector<8x1xf32>
    %15 = arith.maximumf %12, %14 : vector<8x1xf32>
    %16 = arith.subf %12, %15 : vector<8x1xf32>
    %17 = math.exp %16 : vector<8x1xf32>
    %18 = vector.broadcast %15 : vector<8x1xf32> to vector<8x8xf32>
    %19 = arith.subf %11, %18 : vector<8x8xf32>
    %20 = math.exp %19 : vector<8x8xf32>
    %c0_13 = arith.constant 0 : index
    %c0_14 = arith.constant 0 : index
    %21 = vector.load %arg8[%c0_13, %c0_14] : memref<8x1xf32, #tpu.memory_space<vmem>>, vector<8x1xf32>
    %22 = arith.mulf %17, %21 : vector<8x1xf32>
    %cst_15 = arith.constant dense<0.000000e+00> : vector<8xf32>
    %23 = vector.multi_reduction <add>, %20, %cst_15 [1] : vector<8x8xf32> to vector<8xf32>
    %24 = vector.shape_cast %23 : vector<8xf32> to vector<8x1xf32>
    %25 = arith.addf %22, %24 : vector<8x1xf32>
    %c0_16 = arith.constant 0 : index
    %c0_17 = arith.constant 0 : index
    %26 = vector.load %arg8[%c0_16, %c0_17] : memref<8x1xf32, #tpu.memory_space<vmem>>, vector<8x1xf32>
    tpu.vector_store %arg8[%c0_16, %c0_17], %25 {strides = array<i32>} : memref<8x1xf32, #tpu.memory_space<vmem>>, vector<8x1xf32>,
    %c0_18 = arith.constant 0 : index
    %c0_19 = arith.constant 0 : index
    %27 = vector.load %arg9[%c0_18, %c0_19] : memref<8x8xf32, #tpu.memory_space<vmem>>, vector<8x8xf32>
    %28 = vector.broadcast %17 : vector<8x1xf32> to vector<8x8xf32>
    %29 = arith.mulf %28, %27 : vector<8x8xf32>
    %cst_20 = arith.constant dense<0.000000e+00> : vector<8x8xf32>
    %30 = tpu.matmul %20, %10, %cst_20 {dimension_numbers = #tpu.dot_dimension_numbers<[1], [0], [0], [1], [0, 0, 1, 1], [], []>} : vector<8x8xf32>, vector<8x8xf32>, vector<8x8xf32> -> vector<8x8xf32>
    %31 = arith.addf %29, %30 : vector<8x8xf32>
    %c0_21 = arith.constant 0 : index
    %c0_22 = arith.constant 0 : index
    %32 = vector.load %arg9[%c0_21, %c0_22] : memref<8x8xf32, #tpu.memory_space<vmem>>, vector<8x8xf32>
    tpu.vector_store %arg9[%c0_21, %c0_22], %31 {strides = array<i32>} : memref<8x8xf32, #tpu.memory_space<vmem>>, vector<8x8xf32>,
    %c0_23 = arith.constant 0 : index
    %c0_24 = arith.constant 0 : index
    %33 = vector.load %arg7[%c0_23, %c0_24] : memref<8x1xf32, #tpu.memory_space<vmem>>, vector<8x1xf32>
    tpu.vector_store %arg7[%c0_23, %c0_24], %15 {strides = array<i32>} : memref<8x1xf32, #tpu.memory_space<vmem>>, vector<8x1xf32>,
    %c0_i32_25 = arith.constant 0 : i32
    %34 = arith.cmpi eq, %arg2, %c0_i32_25 : i32
    %35 = arith.extui %34 : i1 to i32
    %c0_i32_26 = arith.constant 0 : i32
    %36 = arith.cmpi ne, %35, %c0_i32_26 : i32
    scf.if %36 {
      %c0_27 = arith.constant 0 : index
      %c0_28 = arith.constant 0 : index
      %37 = vector.load %arg8[%c0_27, %c0_28] : memref<8x1xf32, #tpu.memory_space<vmem>>, vector<8x1xf32>
      %38 = tpu.reciprocal %37 {approx = true} : vector<8x1xf32> -> vector<8x1xf32>
      %c0_29 = arith.constant 0 : index
      %c0_30 = arith.constant 0 : index
      %39 = vector.load %arg9[%c0_29, %c0_30] : memref<8x8xf32, #tpu.memory_space<vmem>>, vector<8x8xf32>
      %40 = vector.broadcast %38 : vector<8x1xf32> to vector<8x8xf32>
      %41 = arith.mulf %39, %40 : vector<8x8xf32>
      %c0_31 = arith.constant 0 : index
      %c0_32 = arith.constant 0 : index
      %c0_33 = arith.constant 0 : index
      %42 = vector.load %arg6[%c0_31, %c0_32, %c0_33] : memref<1x8x8xf32, #tpu.memory_space<vmem>>, vector<1x8x8xf32>
      %43 = vector.shape_cast %42 : vector<1x8x8xf32> to vector<8x8xf32>
      %44 = vector.shape_cast %41 : vector<8x8xf32> to vector<1x8x8xf32>
      tpu.vector_store %arg6[%c0_31, %c0_32, %c0_33], %44 {strides = array<i32>} : memref<1x8x8xf32, #tpu.memory_space<vmem>>, vector<1x8x8xf32>,
    } else {
    }
    return
  }
  func.func @transform_0(%arg0: i32, %arg1: i32, %arg2: i32) -> (i32, i32, i32) {
    %c0_i32 = arith.constant 0 : i32
    %c0_i32_0 = arith.constant 0 : i32
    return %arg0, %arg1, %c0_i32 : i32, i32, i32
  }
  func.func @transform_1(%arg0: i32, %arg1: i32, %arg2: i32) -> (i32, i32, i32) {
    %c0_i32 = arith.constant 0 : i32
    %c0_i32_0 = arith.constant 0 : i32
    return %arg0, %arg2, %c0_i32 : i32, i32, i32
  }
  func.func @transform_2(%arg0: i32, %arg1: i32, %arg2: i32) -> (i32, i32, i32) {
    %c0_i32 = arith.constant 0 : i32
    %c0_i32_0 = arith.constant 0 : i32
    return %arg0, %arg2, %c0_i32 : i32, i32, i32
  }
  func.func @transform_3(%arg0: i32, %arg1: i32, %arg2: i32) -> (i32, i32, i32) {
    %c0_i32 = arith.constant 0 : i32
    %c0_i32_0 = arith.constant 0 : i32
    return %arg0, %arg1, %c0_i32 : i32, i32, i32
  }
}

</mosaic_0001>

<bundles_post_ra>
// kernel: full_self_attention.5
= control target key start
LH: loop header
LB: loop body
LE: loop exit
PB: predicated region body
PF: predicated region fallthrough
CT: control target
= control target key end

     0   :  { %vm19_vm0 = vcmask 261120   ;;  %v194_v3 = vmov 0.0   ;;  %s250_s0 = inlined_call_operand.vmem [shape: f32[16,32], index: 0, kind: input, shape index: {}]   ;;  %s251_s1 = inlined_call_operand.vmem [shape: f32[32,32], index: 1, kind: input, shape index: {}]   ;;  %s252_s2 = inlined_call_operand.vmem [shape: f32[1,32], index: 2, kind: input, shape index: {}]   ;;  %s253_s3 = inlined_call_operand.hbm [shape: f32[16,32], index: 3, kind: output, shape index: {}]  }
   0x1   :  { %v29_v0 = vld [vmem:[%s251_s1 + $0x18] sm:$0xff]  ;;  %v28_v1 = vld [vmem:[%s251_s1 + $0x10] sm:$0xff]  ;;  %v24_v2 = vld [vmem:[%s250_s0] sm:$0xff]  ;;  %21 = vst.msk [vmem:[#allocation2 + $0x8] sm:$0xff] %vm19_vm0, %v194_v3 }
   0x2   :  { %157 = vmatprep.subr.mxu0 %v29_v0  ;;  %20 = vst.msk [vmem:[#allocation2] sm:$0xff] %vm19_vm0, %v194_v3  ;;  %v27_v4 = vld [vmem:[%s251_s1 + $0x8] sm:$0xff]  ;;  %165 = vmatprep.mubr.msk.f32.mxu0 %vm19_vm0, %v24_v2 }
   0x3   :  { %158 = vmatpush3.msra.mxu0 %v29_v0 }
   0x4   :  { %8 = vsyncpa [#allocation4], 0  ;;  %159 = vmatprep.subr.mxu0 %v28_v1  ;;  %v26_v5 = vld [vmem:[%s251_s1] sm:$0xff]  ;;  %v25_v6 = vld [vmem:[%s250_s0 + $0x8] sm:$0xff]  ;;  %s195_s25 = smov [#allocation3]  }
   0x5   :  { %160 = vmatpush3.msra.mxu0 %v28_v1  ;;  %v150_v13 = vld [vmem:[%s252_s2] ss:$0 sm:$0xff]  ;;  %s137_s0 = sshll.u32 %s195_s25, 4  ;;  %s138_s0 = int_to_ptr.vmem [resolvable:$true] %s137_s0 }
   0x6   :  { %161 = vmatprep.subr.mxu0 %v27_v4  ;;  %s172_s26 = scalar_lea.vmem %s138_s0, 256  ;;  %p177_p1 = scmp.lt.s32.totalorder %s138_s0, %s138_s0 }
   0x7   :  { %162 = vmatpush3.msra.mxu0 %v27_v4  ;;  %p173_p0 = scmp.ne.s32.totalorder %s138_s0, %s172_s26  ;;  %p178_p2 = scmp.lt.s32.totalorder %s172_s26, %s172_s26 }
   0x8   :  { %163 = vmatprep.subr.mxu0 %v26_v5  ;;  %v23_v7 = vld [vmem:[#allocation2 + $0x8] sm:$0xff] }
   0x9   :  { %164 = vmatpush3.msra.mxu0 %v26_v5  ;;  %v22_v9 = vld [vmem:[#allocation2] sm:$0xff]  ;;  %p179_p3 = por %p178_p2, %p177_p1 }
   0xa   :  { %166 = vmatmul.mubr.msk.f32.vlgmr.msra.gmra.mxu0 %vm19_vm0, %v25_v6 }
   0xb   :  { %p180_p4 = pnand %p179_p3, %p173_p0 }
  0xca   :  { %v167_v8 = vpop.f32.mrf.mxu0 }
  0xcb   :  { %v113_v10 = vadd.f32 %v167_v8, %v23_v7 }
  0xcc   :  { %v103_v11 = vpop.f32.mrf.mxu0 }
  0xcd   :  { %115 = vst.msk [vmem:[#allocation2 + $0x8] sm:$0xff] %vm19_vm0, %v113_v10  ;;  %v112_v12 = vadd.f32 %v103_v11, %v22_v9 }
  0xcf   :  { %114 = vst.msk [vmem:[#allocation2] sm:$0xff] %vm19_vm0, %v112_v12 }
  0xd4   :  { %v120_v14 = vld [vmem:[#allocation2 + $0x8] sm:$0xff] }
  0xd5   :  { %v129_v15 = vadd.f32 %v150_v13, %v120_v14 }
  0xd6   :  { %v119_v16 = vld [vmem:[#allocation2] sm:$0xff] }
  0xd7   :  { %v128_v17 = vadd.f32 %v150_v13, %v119_v16  ;;  %131 = vst.msk [vmem:[#allocation3 + $0x8] sm:$0xff] %vm19_vm0, %v129_v15 }
  0xd9   :  { %130 = vst.msk [vmem:[#allocation3] sm:$0xff] %vm19_vm0, %v128_v17 }
  0xda   :  { %183 = shalt.err (!%p180_p4)
}
  0xdb   :  { %s196_s27 = smov 128   ;;  %s197_s2 = smov 8  }
  0xdc   :  { %143 = dma.vmem_to_hbm [thread:$0]  %s138_s0, 256, %s253_s3, [#allocation4], %s196_s27, %s196_s27, %s197_s2  }
  0xdd   :  { %192 = dma.done.wait [#allocation4], 256  }
  0xde   :  { %193 = vsyncadd [#allocation4], 4294967040 }
  0xdf   :  { %147 = vsyncpa [#allocation4], 1 }

// kernel: full_self_attention.3
= control target key start
LH: loop header
LB: loop body
LE: loop exit
PB: predicated region body
PF: predicated region fallthrough
CT: control target
= control target key end

     0   :  { %8 = vsyncpa [#allocation4], 0  ;;  %s283_s0 = inlined_call_operand.hbm [shape: f32[16,32], index: 0, kind: input, shape index: {}]   ;;  %s284_s1 = inlined_call_operand.hbm [shape: f32[32,96], index: 1, kind: input, shape index: {}]   ;;  %s285_s2 = inlined_call_operand.vmem [shape: f32[1,96], index: 2, kind: input, shape index: {}]   ;;  %s286_s3 = inlined_call_operand.vmem [shape: f32[16,96], index: 3, kind: output, shape index: {}]  }
   0x1   :  { %9 = vsyncpa [#allocation6], 0  ;;  %s235_s12 = smov [#allocation3]  }
   0x2   :  { %s15_s13 = sshll.u32 %s235_s12, 4  ;;  %s16_s13 = int_to_ptr.vmem [resolvable:$true] %s15_s13 }
   0x3   :  { %s199_s14 = scalar_lea.vmem %s16_s13, 256  ;;  %p204_p1 = scmp.lt.s32.totalorder %s16_s13, %s16_s13 }
   0x4   :  { %p200_p0 = scmp.ne.s32.totalorder %s16_s13, %s199_s14  ;;  %p205_p2 = scmp.lt.s32.totalorder %s199_s14, %s199_s14 }
   0x6   :  { %p206_p3 = por %p205_p2, %p204_p1 }
   0x8   :  { %p207_p4 = pnand %p206_p3, %p200_p0 }
   0xa   :  { %210 = shalt.err (!%p207_p4)
}
   0xb   :  { %s236_s15 = smov 128   ;;  %s237_s16 = smov 8  }
   0xc   :  { %21 = dma.hbm_to_vmem [thread:$0]  %s283_s0, 256, %s16_s13, [#allocation4], %s236_s15, %s236_s15, %s237_s16  }
   0xd   :  { %s238_s19 = smov [#allocation5]  }
   0xe   :  { %s27_s20 = sshll.u32 %s238_s19, 4  ;;  %s28_s20 = int_to_ptr.vmem [resolvable:$true] %s27_s20 }
   0xf   :  { %s219_s21 = scalar_lea.vmem %s28_s20, 512  ;;  %p224_p6 = scmp.lt.s32.totalorder %s28_s20, %s28_s20 }
  0x10   :  { %p220_p5 = scmp.ne.s32.totalorder %s28_s20, %s219_s21  ;;  %p225_p7 = scmp.lt.s32.totalorder %s219_s21, %s219_s21 }
  0x12   :  { %p226_p8 = por %p225_p7, %p224_p6 }
  0x14   :  { %p227_p9 = pnand %p226_p8, %p220_p5 }
  0x16   :  { %230 = shalt.err (!%p227_p9)
}
  0x17   :  { %33 = dma.hbm_to_vmem [thread:$0]  %s284_s1, 512, %s28_s20, [#allocation6], %s236_s15, %s236_s15, %s237_s16  }
  0x18   :  { %231 = dma.done.wait [#allocation4], 256  }
  0x19   :  { %232 = vsyncadd [#allocation4], 4294967040 }
  0x1a   :  { %233 = dma.done.wait [#allocation6], 512  }
  0x1b   :  { %234 = vsyncadd [#allocation6], 4294966784  ;;  %vm46_vm0 = vcmask 785408   ;;  %v239_v0 = vmov 0.0   ;;  %vm57_vm1 = vcmask 261120   ;;  %v56_v1 = vld [vmem:[#allocation5 + $0x18] sm:$0xff] }
  0x1c   :  { %48 = vst.msk [vmem:[#allocation2 + $0x8] sm:$0xff] %vm46_vm0, %v239_v0  ;;  %47 = vst.msk [vmem:[#allocation2] sm:$0xff] %vm46_vm0, %v239_v0  ;;  %v55_v2 = vld [vmem:[#allocation5 + $0x10] sm:$0xff]  ;;  %175 = vmatprep.subr.mxu0 %v56_v1  ;;  %v54_v4 = vld [vmem:[#allocation5 + $0x8] sm:$0xff] }
  0x1d   :  { %v51_v3 = vld [vmem:[#allocation3] sm:$0xff]  ;;  %176 = vmatpush3.msra.mxu0 %v56_v1  ;;  %v53_v5 = vld [vmem:[#allocation5] sm:$0xff]  ;;  %v52_v6 = vld [vmem:[#allocation3 + $0x8] sm:$0xff] }
  0x1e   :  { %183 = vmatprep.mubr.msk.f32.mxu0 %vm57_vm1, %v51_v3  ;;  %177 = vmatprep.subr.mxu0 %v55_v2  ;;  %v168_v13 = vld [vmem:[%s285_s2] ss:$0 sm:$0xff] }
  0x1f   :  { %178 = vmatpush3.msra.mxu0 %v55_v2 }
  0x20   :  { %179 = vmatprep.subr.mxu0 %v54_v4 }
  0x21   :  { %180 = vmatpush3.msra.mxu0 %v54_v4 }
  0x22   :  { %181 = vmatprep.subr.mxu0 %v53_v5 }
  0x23   :  { %182 = vmatpush3.msra.mxu0 %v53_v5  ;;  %v50_v7 = vld [vmem:[#allocation2 + $0x8] sm:$0xff]  ;;  %v49_v9 = vld [vmem:[#allocation2] sm:$0xff] }
  0x24   :  { %184 = vmatmul.mubr.msk.f32.vlgmr.msra.gmra.mxu0 %vm57_vm1, %v52_v6 }
  0xe4   :  { %v185_v8 = vpop.f32.mrf.mxu0 }
  0xe5   :  { %v140_v10 = vadd.f32 %v185_v8, %v50_v7 }
  0xe6   :  { %v130_v11 = vpop.f32.mrf.mxu0 }
  0xe7   :  { %143 = vst.msk [vmem:[#allocation2 + $0x8] sm:$0xff] %vm46_vm0, %v140_v10  ;;  %v139_v12 = vadd.f32 %v130_v11, %v49_v9 }
  0xe9   :  { %142 = vst.msk [vmem:[#allocation2] sm:$0xff] %vm46_vm0, %v139_v12 }
  0xee   :  { %v148_v14 = vld [vmem:[#allocation2 + $0x8] sm:$0xff] }
  0xef   :  { %v157_v15 = vadd.f32 %v168_v13, %v148_v14 }
  0xf0   :  { %v147_v16 = vld [vmem:[#allocation2] sm:$0xff] }
  0xf1   :  { %159 = vst.msk [vmem:[%s286_s3 + $0x8] sm:$0xff] %vm46_vm0, %v157_v15  ;;  %v156_v17 = vadd.f32 %v168_v13, %v147_v16 }
  0xf3   :  { %158 = vst.msk [vmem:[%s286_s3] sm:$0xff] %vm46_vm0, %v156_v17 }
  0xf4   :  { %164 = vsyncpa [#allocation4], 1 }
  0xf5   :  { %165 = vsyncpa [#allocation6], 1 }

// kernel: full_self_attention.4
= control target key start
LH: loop header
LB: loop body
LE: loop exit
PB: predicated region body
PF: predicated region fallthrough
CT: control target
= control target key end

     0   :  { %s689_s12 = smov 0   ;;  %s691_s13 = smov 0   ;;  %s746_s0 = inlined_call_operand.vmem [shape: f32[8,8,8], index: 0, kind: input, shape index: {}]   ;;  %s747_s1 = inlined_call_operand.vmem [shape: f32[8,8,8], index: 1, kind: input, shape index: {}]   ;;  %s748_s2 = inlined_call_operand.vmem [shape: f32[8,8,8], index: 2, kind: input, shape index: {}]   ;;  %s749_s3 = inlined_call_operand.vmem [shape: f32[8,8,8], index: 3, kind: output, shape index: {}]  }
   0x1   :  { %s693_s14 = smov 0  }
   0x2 LB: > { %s32_s15 = sadd.s32 1, %s659_s13  ;;  %p581_p0 = scmp.ge.s32.totalorder %s663_s14, 1  ;;  %s663_s14 = sphi %s693_s14, %s13_s14   ;;  %s659_s13 = sphi %s691_s13, %s751_s13   ;;  %s655_s12 = sphi %s689_s12, %s750_s12  }
   0x3   : > { %p34_p1 = scmp.ge.s32.totalorder %s32_s15, 8  ;;  %p190_p2 = scmp.lt.s32.totalorder %s663_s14, 9 }
   0x5   : > { %s753_s15 = smov (%p34_p1, %s32_s15), 0  ;;  %p191_p3 = pnand %p581_p0, %p190_p2 }
   0x6   : > { %p232_p4 = scmp.lt.s32.totalorder (!%p191_p3), %s655_s12, 7 }
   0x7   : > { %194 = sbr.rel (%p191_p3) target bundleno = 785 (0x311), region = 32 }
   0xc   : > { %vm267_vm0 = vcmask 64512   ;;  %v665_v0 = vmov 0.0   ;;  %vm666_vm1 = vmmov 0   ;;  %s755_s12 = smov (!%p232_p4, %s655_s12), 7  ;;  %vm264_vm2 = vcmask 7168  }
   0xd   : > { %595 = vmatprep.subr.mxu0 %v665_v0  ;;  %268 = vst.msk [vmem:[#allocation4] sm:$0xff] %vm267_vm0, %v665_v0  ;;  %597 = vmatprep.mubr.msk.f32.mxu0 %vm666_vm1, %v665_v0  ;;  %s708_s16 = sshll.u32 %s755_s12, 3  ;;  %v667_v4 = vmov -inf   ;;  %v668_v8 = vmov 0  }
   0xe   : > { %600 = vmatprep.subr.mxu1 %v665_v0  ;;  %602 = vmatprep.mubr.msk.f32.mxu1 %vm666_vm1, %v665_v0  ;;  %s245_s19 = scalar_lea.vmem %s747_s1, %s708_s16  ;;  %s238_s22 = scalar_lea.vmem %s746_s0, %s708_s16  ;;  %265 = vst.msk [vmem:[#allocation2] sm:$0xff] %vm264_vm2, %v667_v4  ;;  %266 = vst.msk [vmem:[#allocation3] sm:$0xff] %vm264_vm2, %v665_v0 }
   0xf   : > { %v271_v1 = vld [vmem:[%s245_s19] sm:$0xff]  ;;  %633 = vset.pattern.permute.xlu0 %v668_v8  ;;  %634 = vset.pattern.permute.xlu1 %v668_v8  ;;  %s252_s25 = scalar_lea.vmem %s748_s2, %s708_s16  ;;  %s259_s28 = scalar_lea.vmem %s749_s3, %s708_s16 }
  0x10   : > { %v269_v2 = vld [vmem:[%s238_s22] sm:$0xff]  ;;  %596 = vmatpush3.xpose.msk.msra.mxu0 %vm267_vm0, %v271_v1 }
  0x11   : > { %v270_v3 = vmul.f32 0.35355338, %v269_v2  ;;  %v272_v13 = vld [vmem:[%s252_s25] sm:$0xff] }
  0x12   : > { %601 = vmatpush3.msra.mxu1 %v272_v13 }
  0x13   : > { %598 = vmatmul.mubr.msk.f32.vlgmr.msra.gmra.mxu0 %vm267_vm0, %v270_v3 }
  0x14   : > { %v374_v27 = vld [vmem:[#allocation4] sm:$0xff] }
  0x15   : > { %v350_v9 = vld [vmem:[#allocation2] sm:$0xff]  ;;  %v366_v21 = vld [vmem:[#allocation3] sm:$0xff] }
  0xd3   : > { %v346_v5 = vpop.f32.mrf.mxu0 }
  0xd4   : > { %v351_v6 = vsel %vm267_vm0, %v346_v5, -inf }
  0xd5   : > { %352 = vmax.xlane.f32.xlu0 %v351_v6  ;;  %v599_v7 = vpop.f32.mrf.mxu0 }
 0x15e   : > { %v353_v10 = vpop.xlane.xlu0 %352 }
 0x15f   : > { %v354_v11 = vmax.f32 %v350_v9, %v353_v10 }
 0x161   : > { %v355_v12 = vsub.f32 %v350_v9, %v354_v11  ;;  %456 = vst.msk [vmem:[#allocation2] sm:$0xff] %vm264_vm2, %v354_v11  ;;  %360 = vperm.xlu0 %633, %v354_v11  }
 0x163   : > { %v356_v18 = vmul.f32 1.442695, %v355_v12 }
 0x1dc   : > { %v361_v14 = vpop.permute.xlu0 %360 }
 0x1dd   : > { %v363_v15 = vsub.f32 %v346_v5, %v361_v14 }
 0x1df   : > { %v364_v16 = vmul.f32 1.442695, %v363_v15 }
 0x1e1   : > { %635 = vpow2.f32 %v364_v16 }
 0x1e2   : > { %637 = vpow2.f32 %v356_v18 }
 0x1ee   : > { %v636_v17 = vpop.eup %635 }
 0x1ef   : > { %603 = vmatmul.mubr.msk.f32.vlgmr.msra.gmra.mxu1 %vm267_vm0, %v636_v17  ;;  %v368_v19 = vsel %vm267_vm0, %v636_v17, 0.0  ;;  %v638_v20 = vpop.eup %637 }
 0x1f0   : > { %369 = vadd.xlane.f32.xlu1 %v368_v19  ;;  %v367_v22 = vmul.f32 %v638_v20, %v366_v21 }
 0x201   : > { %377 = vperm.xlu1 %634, %v638_v20  }
 0x279   : > { %v370_v23 = vpop.xlane.xlu1 %369 }
 0x27a   : > { %v371_v24 = vadd.f32 %v370_v23, %v367_v22 }
 0x27c   : > { %373 = vst.msk [vmem:[#allocation3] sm:$0xff] %vm264_vm2, %v371_v24 }
 0x27d   : > { %v378_v28 = vpop.permute.xlu1 %377 }
 0x27e   : > { %v380_v29 = vmul.f32 %v378_v28, %v374_v27 }
 0x283   : > { %v460_v25 = vld [vmem:[#allocation3] sm:$0xff] }
 0x284   : > { %639 = vrcp.f32 %v460_v25 }
 0x291   : > { %v640_v26 = vpop.eup %639 }
 0x292   : > { %465 = vperm.xlu1 %634, %v640_v26  }
 0x2af   : > { %v450_v30 = vpop.f32.mrf.mxu1 }
 0x2b0   : > { %v454_v31 = vadd.f32 %v450_v30, %v380_v29 }
 0x2b1   : > { %v604_v32 = vpop.f32.mrf.mxu1 }
 0x2b2   : > { %455 = vst.msk [vmem:[#allocation4] sm:$0xff] %vm267_vm0, %v454_v31 }
 0x2b9   : > { %v462_v33 = vld [vmem:[#allocation4] sm:$0xff] }
 0x30d   : > { %v466_v34 = vpop.permute.xlu1 %465 }
 0x30e   : > { %v468_v35 = vmul.f32 %v466_v34, %v462_v33 }
 0x310   : > { %469 = vst.msk [vmem:[%s259_s28] sm:$0xff] %vm267_vm0, %v468_v35 }
 0x311 PF: > { %s13_s14 = sadd.s32 1, %s663_s14   ;;  %s750_s12 = smov %s659_s13 }
 0x312   : > { %p10_p5 = scmp.ge.s32.totalorder %s13_s14, 10   ;;  %s751_s13 = smov %s753_s15 }
 0x314   :  { %12 = sbr.rel (!%p10_p5) target bundleno = 2 (0x2), region = 76 }

</bundles_post_ra>
